<compile_context>
chip_gen: v6e
topology: v6e:2x2x1
jax: 0.10.0
libtpu: 0.0.40
codegen_flags: <defaults>
</compile_context>

<pallas_src>
import functools

import jax
import jax.numpy as jnp
from jax.experimental import pallas as pl
from jax.experimental.pallas import tpu as pltpu


def _round_up(x, m):
    return ((x + m - 1) // m) * m


def _mlp_kernel(x_ref, w1_ref, b1_ref, w2_ref, b2_ref, q_ref):
    # Two MXU matmuls + VPU bias/relu on one lane-dense (TB, 128) tile.
    x = x_ref[...]                                                  # (TB, in_size)
    h = jnp.dot(x, w1_ref[...], preferred_element_type=jnp.float32)
    h = jnp.maximum(h + b1_ref[...], 0.0)                           # (TB, 128)
    q = jnp.dot(h, w2_ref[...], preferred_element_type=jnp.float32)
    q_ref[...] = q + b2_ref[...]                                    # (TB, 128)


@functools.partial(jax.jit, static_argnames=("block_b",))
def network_forward(state, w1, b1, w2, b2, *, block_b=1024):
    """state: (B, input_size) f32; w1: (input_size, 30); b1: (30,);
    w2: (30, nb_action); b2: (nb_action,).  Returns (B, nb_action) f32."""
    state = jnp.asarray(state, jnp.float32)
    B, in_size = state.shape
    H = w1.shape[1]
    nb_action = w2.shape[1]

    # Lane-dense padded feature widths (multiples of 128).
    HP = _round_up(H, 128)
    NP = _round_up(nb_action, 128)

    # Zero-pad the tiny weights/biases (negligible bytes; padded units have
    # zero weight & bias -> contribute exactly 0).
    w1p = jnp.zeros((in_size, HP), jnp.float32).at[:, :H].set(w1)
    b1p = jnp.zeros((1, HP), jnp.float32).at[0, :H].set(b1)
    w2p = jnp.zeros((HP, NP), jnp.float32).at[:H, :nb_action].set(w2)
    b2p = jnp.zeros((1, NP), jnp.float32).at[0, :nb_action].set(b2)

    # Batch tile: multiple of 8 (f32 sublane tile), capped at block_b.
    TB = min(block_b, _round_up(B, 8))
    Bp = _round_up(B, TB)
    if Bp != B:
        state = jnp.pad(state, ((0, Bp - B), (0, 0)))
    grid = (Bp // TB,)

    out_padded = pl.pallas_call(
        _mlp_kernel,
        out_shape=jax.ShapeDtypeStruct((Bp, NP), jnp.float32),
        grid_spec=pltpu.PrefetchScalarGridSpec(
            num_scalar_prefetch=0,
            grid=grid,
            in_specs=[
                # activations: tiled over batch, streamed through the pipeline
                pl.BlockSpec((TB, in_size), lambda i: (i, 0)),
                # weights / biases: whole-array blocks, VMEM-resident across
                # all batch tiles (constant index_map -> no re-DMA per tile)
                pl.BlockSpec((in_size, HP), lambda i: (0, 0)),
                pl.BlockSpec((1, HP), lambda i: (0, 0)),
                pl.BlockSpec((HP, NP), lambda i: (0, 0)),
                pl.BlockSpec((1, NP), lambda i: (0, 0)),
            ],
            out_specs=pl.BlockSpec((TB, NP), lambda i: (i, 0)),
        ),
        compiler_params=pltpu.CompilerParams(
            dimension_semantics=("parallel",),  # shard batch tiles across TCs (v7x)
        ),
    )(state, w1p, b1p, w2p, b2p)

    return out_padded[:B, :nb_action]


def init_params(key, input_size, nb_action, hidden=30):
    """Deterministic init matching nn.Linear's U(-1/sqrt(fan_in), 1/sqrt(fan_in))."""
    k1, k2, k3, k4 = jax.random.split(key, 4)
    bound1 = 1.0 / jnp.sqrt(jnp.float32(input_size))
    bound2 = 1.0 / jnp.sqrt(jnp.float32(hidden))
    w1 = jax.random.uniform(k1, (input_size, hidden), jnp.float32, -bound1, bound1)
    b1 = jax.random.uniform(k2, (hidden,), jnp.float32, -bound1, bound1)
    w2 = jax.random.uniform(k3, (hidden, nb_action), jnp.float32, -bound2, bound2)
    b2 = jax.random.uniform(k4, (nb_action,), jnp.float32, -bound2, bound2)
    return w1, b1, w2, b2


if __name__ == "__main__":
    input_size = 5   # small DQN-style state vector
    nb_action = 3
    batch = 8

    key = jax.random.PRNGKey(0)
    k_state, k_params, k_state2 = jax.random.split(key, 3)
    w1, b1, w2, b2 = init_params(k_params, input_size, nb_action)

    # Small inference-style batch.
    state = jax.random.normal(k_state, (batch, input_size), jnp.float32)
    q_values = network_forward(state, w1, b1, w2, b2)
    jax.block_until_ready(q_values)
    ref = jnp.maximum(state @ w1 + b1, 0.0) @ w2 + b2
    assert q_values.shape == (batch, nb_action)
    assert jnp.allclose(q_values, ref, atol=1e-5), "mismatch vs reference (batch=8)"

    # Odd batch size exercises the wrapper-side batch padding / tiling path.
    state2 = jax.random.normal(k_state2, (37, input_size), jnp.float32)
    q2 = network_forward(state2, w1, b1, w2, b2)
    jax.block_until_ready(q2)
    ref2 = jnp.maximum(state2 @ w1 + b1, 0.0) @ w2 + b2
    assert q2.shape == (37, nb_action)
    assert jnp.allclose(q2, ref2, atol=1e-5), "mismatch vs reference (batch=37)"

    print("KERNEL_OK")
</pallas_src>

<mosaic_0001>
module attributes {stable_mosaic.version = 11 : i64} {
  func.func @_mlp_kernel(%arg0: i32, %arg1: memref<8x5xf32, #tpu.memory_space<vmem>>, %arg2: memref<5x128xf32, #tpu.memory_space<vmem>>, %arg3: memref<1x128xf32, #tpu.memory_space<vmem>>, %arg4: memref<128x128xf32, #tpu.memory_space<vmem>>, %arg5: memref<1x128xf32, #tpu.memory_space<vmem>>, %arg6: memref<8x128xf32, #tpu.memory_space<vmem>>) attributes {dimension_semantics = [#tpu.dimension_semantics<parallel>], iteration_bounds = array<i64: 1>, scalar_prefetch = 0 : i64, scratch_operands = 0 : i64, tpu.core_type = #tpu.core_type<tc>, window_params = [{transform_indices = @transform_0, window_bounds = array<i64: 8, 5>}, {pipeline_mode = #tpu.pipeline_mode<synchronous>, transform_indices = @transform_1, window_bounds = array<i64: 5, 128>}, {pipeline_mode = #tpu.pipeline_mode<synchronous>, transform_indices = @transform_2, window_bounds = array<i64: 1, 128>}, {pipeline_mode = #tpu.pipeline_mode<synchronous>, transform_indices = @transform_3, window_bounds = array<i64: 128, 128>}, {pipeline_mode = #tpu.pipeline_mode<synchronous>, transform_indices = @transform_4, window_bounds = array<i64: 1, 128>}, {transform_indices = @transform_5, window_bounds = array<i64: 8, 128>}]} {
    %c0 = arith.constant 0 : index
    %c0_0 = arith.constant 0 : index
    %0 = vector.load %arg1[%c0, %c0_0] : memref<8x5xf32, #tpu.memory_space<vmem>>, vector<8x5xf32>
    %c0_1 = arith.constant 0 : index
    %c0_2 = arith.constant 0 : index
    %1 = vector.load %arg2[%c0_1, %c0_2] : memref<5x128xf32, #tpu.memory_space<vmem>>, vector<5x128xf32>
    %cst = arith.constant dense<0.000000e+00> : vector<8x128xf32>
    %2 = tpu.matmul %0, %1, %cst {dimension_numbers = #tpu.dot_dimension_numbers<[1], [0], [0], [1], [0, 0, 1, 1], [], []>} : vector<8x5xf32>, vector<5x128xf32>, vector<8x128xf32> -> vector<8x128xf32>
    %c0_3 = arith.constant 0 : index
    %c0_4 = arith.constant 0 : index
    %3 = vector.load %arg3[%c0_3, %c0_4] : memref<1x128xf32, #tpu.memory_space<vmem>>, vector<1x128xf32>
    %4 = vector.broadcast %3 : vector<1x128xf32> to vector<8x128xf32>
    %5 = arith.addf %2, %4 : vector<8x128xf32>
    %cst_5 = arith.constant 0.000000e+00 : f32
    %6 = vector.broadcast %cst_5 : f32 to vector<8x128xf32>
    %7 = arith.maximumf %5, %6 : vector<8x128xf32>
    %c0_6 = arith.constant 0 : index
    %c0_7 = arith.constant 0 : index
    %8 = vector.load %arg4[%c0_6, %c0_7] : memref<128x128xf32, #tpu.memory_space<vmem>>, vector<128x128xf32>
    %cst_8 = arith.constant dense<0.000000e+00> : vector<8x128xf32>
    %9 = tpu.matmul %7, %8, %cst_8 {dimension_numbers = #tpu.dot_dimension_numbers<[1], [0], [0], [1], [0, 0, 1, 1], [], []>} : vector<8x128xf32>, vector<128x128xf32>, vector<8x128xf32> -> vector<8x128xf32>
    %c0_9 = arith.constant 0 : index
    %c0_10 = arith.constant 0 : index
    %10 = vector.load %arg5[%c0_9, %c0_10] : memref<1x128xf32, #tpu.memory_space<vmem>>, vector<1x128xf32>
    %11 = vector.broadcast %10 : vector<1x128xf32> to vector<8x128xf32>
    %12 = arith.addf %9, %11 : vector<8x128xf32>
    %c0_11 = arith.constant 0 : index
    %c0_12 = arith.constant 0 : index
    %13 = vector.load %arg6[%c0_11, %c0_12] : memref<8x128xf32, #tpu.memory_space<vmem>>, vector<8x128xf32>
    tpu.vector_store %arg6[%c0_11, %c0_12], %12 {strides = array<i32>} : memref<8x128xf32, #tpu.memory_space<vmem>>, vector<8x128xf32>,
    return
  }
  func.func @transform_0(%arg0: i32) -> (i32, i32) {
    %c0_i32 = arith.constant 0 : i32
    %c0_i32_0 = arith.constant 0 : i32
    return %arg0, %c0_i32 : i32, i32
  }
  func.func @transform_1(%arg0: i32) -> (i32, i32) {
    %c0_i32 = arith.constant 0 : i32
    %c0_i32_0 = arith.constant 0 : i32
    %c0_i32_1 = arith.constant 0 : i32
    return %c0_i32, %c0_i32_0 : i32, i32
  }
  func.func @transform_2(%arg0: i32) -> (i32, i32) {
    %c0_i32 = arith.constant 0 : i32
    %c0_i32_0 = arith.constant 0 : i32
    %c0_i32_1 = arith.constant 0 : i32
    return %c0_i32, %c0_i32_0 : i32, i32
  }
  func.func @transform_3(%arg0: i32) -> (i32, i32) {
    %c0_i32 = arith.constant 0 : i32
    %c0_i32_0 = arith.constant 0 : i32
    %c0_i32_1 = arith.constant 0 : i32
    return %c0_i32, %c0_i32_0 : i32, i32
  }
  func.func @transform_4(%arg0: i32) -> (i32, i32) {
    %c0_i32 = arith.constant 0 : i32
    %c0_i32_0 = arith.constant 0 : i32
    %c0_i32_1 = arith.constant 0 : i32
    return %c0_i32, %c0_i32_0 : i32, i32
  }
  func.func @transform_5(%arg0: i32) -> (i32, i32) {
    %c0_i32 = arith.constant 0 : i32
    %c0_i32_0 = arith.constant 0 : i32
    return %arg0, %c0_i32 : i32, i32
  }
}

</mosaic_0001>

<bundles_post_ra>
// kernel: network_forward.1
= control target key start
LH: loop header
LB: loop body
LE: loop exit
PB: predicated region body
PF: predicated region fallthrough
CT: control target
= control target key end

     0   :  { %vm33_vm0 = vcmask 1044480   ;;  %vm29_vm1 = vcmask 39936   ;;  %v271_v0 = vmov 0.0   ;;  %vm272_vm2 = vmmov 0   ;;  %s366_s1 = inlined_call_operand.vmem [shape: f32[5,128], index: 1, kind: input, shape index: {}]   ;;  %s367_s0 = inlined_call_operand.vmem [shape: f32[8,5], index: 0, kind: input, shape index: {}]   ;;  %s368_s3 = inlined_call_operand.vmem [shape: f32[128,128], index: 3, kind: input, shape index: {}]   ;;  %s369_s2 = inlined_call_operand.vmem [shape: f32[1,128], index: 2, kind: input, shape index: {}]   ;;  %s370_s4 = inlined_call_operand.vmem [shape: f32[1,128], index: 4, kind: input, shape index: {}]   ;;  %s371_s5 = inlined_call_operand.vmem [shape: f32[8,128], index: 5, kind: output, shape index: {}]  }
   0x1   :  { %229 = vmatprep.subr.mxu0 %v271_v0  ;;  %v21_v1 = vld [vmem:[%s366_s1] sm:$0x1f]  ;;  %231 = vmatprep.mubr.msk.f32.mxu0 %vm272_vm2, %v271_v0  ;;  %v123_v3 = vld [vmem:[%s368_s3 + $0x78] sm:$0xff]  ;;  %v122_v4 = vld [vmem:[%s368_s3 + $0x70] sm:$0xff] }
   0x2   :  { %v20_v2 = vld [vmem:[%s367_s0] sm:$0xff]  ;;  %230 = vmatpush3.msk.msra.mxu0 %vm33_vm0, %v21_v1  ;;  %234 = vmatprep.subr.mxu1 %v271_v0  ;;  %v121_v5 = vld [vmem:[%s368_s3 + $0x68] sm:$0xff]  ;;  %v119_v7 = vld [vmem:[%s368_s3 + $0x58] sm:$0xff] }
   0x3   :  { %232 = vmatmul.mubr.msk.f32.vlgmr.msra.gmra.mxu0 %vm29_vm1, %v20_v2  ;;  %235 = vmatpush3.msra.mxu1 %v123_v3  ;;  %v120_v6 = vld [vmem:[%s368_s3 + $0x60] sm:$0xff]  ;;  %v118_v8 = vld [vmem:[%s368_s3 + $0x50] sm:$0xff]  ;;  %v117_v9 = vld [vmem:[%s368_s3 + $0x48] sm:$0xff] }
   0x4   :  { %236 = vmatprep.subr.mxu1 %v271_v0  ;;  %266 = vmatprep.mubr.msk.f32.mxu1 %vm272_vm2, %v271_v0  ;;  %v116_v10 = vld [vmem:[%s368_s3 + $0x40] sm:$0xff]  ;;  %v115_v11 = vld [vmem:[%s368_s3 + $0x38] sm:$0xff]  ;;  %v114_v12 = vld [vmem:[%s368_s3 + $0x30] sm:$0xff] }
   0x5   :  { %237 = vmatpush3.msra.mxu1 %v122_v4  ;;  %v113_v13 = vld [vmem:[%s368_s3 + $0x28] sm:$0xff]  ;;  %v112_v14 = vld [vmem:[%s368_s3 + $0x20] sm:$0xff]  ;;  %v111_v15 = vld [vmem:[%s368_s3 + $0x18] sm:$0xff] }
   0x6   :  { %238 = vmatprep.subr.mxu1 %v271_v0  ;;  %v110_v16 = vld [vmem:[%s368_s3 + $0x10] sm:$0xff]  ;;  %v109_v17 = vld [vmem:[%s368_s3 + $0x8] sm:$0xff]  ;;  %v108_v18 = vld [vmem:[%s368_s3] sm:$0xff] }
   0x7   :  { %239 = vmatpush3.msra.mxu1 %v121_v5  ;;  %v206_v19 = vld [vmem:[%s369_s2] ss:$0 sm:$0xff] }
   0x8   :  { %240 = vmatprep.subr.mxu1 %v271_v0  ;;  %v209_v24 = vld [vmem:[%s370_s4] ss:$0 sm:$0xff] }
   0x9   :  { %241 = vmatpush3.msra.mxu1 %v120_v6 }
   0xa   :  { %242 = vmatprep.subr.mxu1 %v271_v0 }
   0xb   :  { %243 = vmatpush3.msra.mxu1 %v119_v7 }
   0xc   :  { %244 = vmatprep.subr.mxu1 %v271_v0 }
   0xd   :  { %245 = vmatpush3.msra.mxu1 %v118_v8 }
   0xe   :  { %246 = vmatprep.subr.mxu1 %v271_v0 }
   0xf   :  { %247 = vmatpush3.msra.mxu1 %v117_v9 }
  0x10   :  { %248 = vmatprep.subr.mxu1 %v271_v0 }
  0x11   :  { %249 = vmatpush3.msra.mxu1 %v116_v10 }
  0x12   :  { %250 = vmatprep.subr.mxu1 %v271_v0 }
  0x13   :  { %251 = vmatpush3.msra.mxu1 %v115_v11 }
  0x14   :  { %252 = vmatprep.subr.mxu1 %v271_v0 }
  0x15   :  { %253 = vmatpush3.msra.mxu1 %v114_v12 }
  0x16   :  { %254 = vmatprep.subr.mxu1 %v271_v0 }
  0x17   :  { %255 = vmatpush3.msra.mxu1 %v113_v13 }
  0x18   :  { %256 = vmatprep.subr.mxu1 %v271_v0 }
  0x19   :  { %257 = vmatpush3.msra.mxu1 %v112_v14 }
  0x1a   :  { %258 = vmatprep.subr.mxu1 %v271_v0 }
  0x1b   :  { %259 = vmatpush3.msra.mxu1 %v111_v15 }
  0x1c   :  { %260 = vmatprep.subr.mxu1 %v271_v0 }
  0x1d   :  { %261 = vmatpush3.msra.mxu1 %v110_v16 }
  0x1e   :  { %262 = vmatprep.subr.mxu1 %v271_v0 }
  0x1f   :  { %263 = vmatpush3.msra.mxu1 %v109_v17 }
  0x20   :  { %264 = vmatprep.subr.mxu1 %v271_v0 }
  0x21   :  { %265 = vmatpush3.msra.mxu1 %v108_v18 }
  0xc3   :  { %v103_v20 = vpop.f32.mrf.mxu0 }
  0xc4   :  { %v104_v21 = vadd.f32 %v206_v19, %v103_v20 }
  0xc5   :  { %v233_v22 = vpop.f32.mrf.mxu0 }
  0xc6   :  { %v107_v23 = vmax.f32 %v104_v21, 0.0 }
  0xc8   :  { %267 = vmatmul.mubr.f32.vlgmr.msra.gmra.mxu1 %v107_v23 }
 0x188   :  { %v197_v25 = vpop.f32.mrf.mxu1 }
 0x189   :  { %v198_v26 = vadd.f32 %v209_v24, %v197_v25 }
 0x18a   :  { %v268_v27 = vpop.f32.mrf.mxu1 }
 0x18b   :  { %201 = vst [vmem:[%s371_s5] sm:$0xff] %v198_v26 }

</bundles_post_ra>
